<compile_context>
chip_gen: v5e
topology: v5e:2x2
jax: 0.10.0
libtpu: 0.0.40
codegen_flags: <defaults>
</compile_context>

<pallas_src>
import functools
import math

import jax
import jax.numpy as jnp
from jax import lax
from jax.experimental import pallas as pl
from jax.experimental.pallas import tpu as pltpu

# ----------------------------- config (small, synthetic) --------------------
BATCH = 2
SEQ = 8
NUM_HEADS = 4
HEAD_DIM = 8
HALF = HEAD_DIM // 2
HIDDEN = NUM_HEADS * HEAD_DIM          # 32
QKV_OUT = 3 * HIDDEN                   # multi_query=False, new_decoder_arch=False
ROPE_THETA = 10000.0
INV_NORM_FACTOR = 1.0 / math.sqrt(HEAD_DIM)

# TODO(synk): layer_past KV-cache concat, pseudo_quantize_tensor (kv_bit<16),
# attention/hidden dropout, head_mask, alibi and the multi_query /
# new_decoder_architecture head layouts are not exercised by this config.
# TODO(synk): for production Falcon shapes (HIDDEN=4544, long seq) the
# whole-block matmuls must become tiled MXU matmuls (256-aligned tiles on
# v6e/v7x, 128 on v5e), the weight BlockSpecs should get pl.Buffered(1), the
# head loop should become a grid axis, and the output should be presented
# lane-dense (>=128-wide N tiles); none of that matters at HIDDEN=32.


# ----------------------------- fused Pallas kernel ---------------------------
def _falcon_attn_kernel(x_ref, wqkv_ref, wd_ref, cos_ref, sin_lo_ref, sin_hi_ref,
                        mask_ref, o_ref, ctx_ref, *, bb, seq):
    """Processes `bb` batch elements (bb*seq rows) per grid step, all in VMEM."""
    x = x_ref[...]                                      # [bb*S, HIDDEN] bf16

    # Single fused QKV projection (head-major columns), f32 accumulation.
    qkv = jnp.dot(x, wqkv_ref[...], preferred_element_type=jnp.float32)
    q2 = qkv[:, 0 * HIDDEN:1 * HIDDEN]                  # [bb*S, HIDDEN] f32
    k2 = qkv[:, 1 * HIDDEN:2 * HIDDEN]
    v2 = qkv[:, 2 * HIDDEN:3 * HIDDEN]

    cos = cos_ref[...]                                  # [bb*S, HIDDEN] f32
    sin_lo = sin_lo_ref[...]                            # -sin on lower-half lanes, 0 elsewhere
    sin_hi = sin_hi_ref[...]                            # +sin on upper-half lanes, 0 elsewhere

    def rope(t):
        # Per-head rotate_half on the full lane-dense block:
        #   roll by +HALF feeds the lower-half lanes, roll by -HALF feeds the
        #   upper-half lanes; lanes that would pick up the neighbouring head are
        #   zeroed by the masked sin tables, so no per-head slicing is needed.
        roll_p = jnp.concatenate([t[:, HALF:], t[:, :HALF]], axis=-1)
        roll_m = jnp.concatenate([t[:, -HALF:], t[:, :-HALF]], axis=-1)
        return t * cos + roll_p * sin_lo + roll_m * sin_hi

    q2 = rope(q2) * INV_NORM_FACTOR      # scale folded into q (S*D muls, not S*S)
    k2 = rope(k2)

    # bf16 operands for the MXU; accumulation stays f32.
    q_b = q2.astype(jnp.bfloat16)
    k_b = k2.astype(jnp.bfloat16)
    v_b = v2.astype(jnp.bfloat16)

    for b in range(bb):                                 # static, tiny
        mask = mask_ref[b]                              # [S, S] f32 additive mask
        r0 = b * seq
        for h in range(NUM_HEADS):                      # static, tiny
            c0 = h * HEAD_DIM
            qh = q_b[r0:r0 + seq, c0:c0 + HEAD_DIM]
            kh = k_b[r0:r0 + seq, c0:c0 + HEAD_DIM]
            vh = v_b[r0:r0 + seq, c0:c0 + HEAD_DIM]

            # scores = (q/sqrt(d)) @ k^T  (contract last dims, f32 accumulate)
            s = lax.dot_general(qh, kh, (((1,), (1,)), ((), ())),
                                preferred_element_type=jnp.float32)
            s = s + mask                                # mask add stays in f32
            s = s - jnp.max(s, axis=-1, keepdims=True)
            p = jnp.exp(s)
            inv = 1.0 / jnp.sum(p, axis=-1, keepdims=True)   # exact, [S,1] f32

            ctx_h = jnp.dot(p.astype(jnp.bfloat16), vh,
                            preferred_element_type=jnp.float32) * inv
            # write the head's context straight into its lane window (no concat)
            ctx_ref[r0:r0 + seq, c0:c0 + HEAD_DIM] = ctx_h

    # _merge_heads is already the scratch layout; output dense projection.
    o_ref[...] = jnp.dot(ctx_ref[...].astype(jnp.bfloat16), wd_ref[...],
                         preferred_element_type=jnp.float32).astype(o_ref.dtype)


def falcon_attention_pallas(x2d_bf16, w_qkv_hm, w_dense, cos_t, sin_lo_t, sin_hi_t,
                            mask_bss, *, batch_blocks=1):
    BS, _ = x2d_bf16.shape
    B = mask_bss.shape[0]
    S = BS // B
    assert B % batch_blocks == 0
    bb = B // batch_blocks                              # batches per grid step
    kernel = functools.partial(_falcon_attn_kernel, bb=bb, seq=S)
    return pl.pallas_call(
        kernel,
        out_shape=jax.ShapeDtypeStruct((BS, HIDDEN), jnp.float32),
        grid=(batch_blocks,),
        in_specs=[
            pl.BlockSpec((bb * S, HIDDEN), lambda i: (i, 0)),       # x rows
            pl.BlockSpec((HIDDEN, QKV_OUT), lambda i: (0, 0)),      # fused qkv weight (bf16)
            pl.BlockSpec((HIDDEN, HIDDEN), lambda i: (0, 0)),       # dense weight (bf16)
            pl.BlockSpec((bb * S, HIDDEN), lambda i: (i, 0)),       # cos (head+batch tiled)
            pl.BlockSpec((bb * S, HIDDEN), lambda i: (i, 0)),       # masked -sin (lower half)
            pl.BlockSpec((bb * S, HIDDEN), lambda i: (i, 0)),       # masked +sin (upper half)
            pl.BlockSpec((bb, S, S), lambda i: (i, 0, 0)),          # additive mask
        ],
        out_specs=pl.BlockSpec((bb * S, HIDDEN), lambda i: (i, 0)),
        scratch_shapes=[pltpu.VMEM((bb * S, HIDDEN), jnp.float32)],  # merged-heads ctx
        compiler_params=pltpu.CompilerParams(
            dimension_semantics=("parallel",),
            vmem_limit_bytes=32 * 1024 * 1024),
    )(x2d_bf16, w_qkv_hm, w_dense, cos_t, sin_lo_t, sin_hi_t, mask_bss)


# ----------------------------- init-time helpers (run once) ------------------
def rotary_tables(seq_len, dim, base):
    # FalconRotaryEmbedding cached tables (float32).
    inv_freq = 1.0 / (base ** (jnp.arange(0, dim, 2, dtype=jnp.float32) / dim))
    t = jnp.arange(seq_len, dtype=jnp.float32)
    freqs = jnp.outer(t, inv_freq)
    emb = jnp.concatenate([freqs, freqs], axis=-1)
    return jnp.cos(emb), jnp.sin(emb)                   # each [seq_len, dim]


def build_params(w_qkv, w_dense, max_seq):
    """Head-major split of the fused QKV weight, concatenated q|k|v, bf16 cast."""
    w = w_qkv.reshape(HIDDEN, NUM_HEADS, 3, HEAD_DIM)
    w_q = w[:, :, 0, :].reshape(HIDDEN, HIDDEN)
    w_k = w[:, :, 1, :].reshape(HIDDEN, HIDDEN)
    w_v = w[:, :, 2, :].reshape(HIDDEN, HIDDEN)
    w_qkv_hm = jnp.concatenate([w_q, w_k, w_v], axis=1).astype(jnp.bfloat16)
    cos, sin = rotary_tables(max_seq, HEAD_DIM, ROPE_THETA)
    return {"w_qkv_hm": w_qkv_hm,
            "w_dense": w_dense.astype(jnp.bfloat16),
            "cos_cached": cos, "sin_cached": sin}


# ----------------------------- forward wrapper --------------------------------
@functools.partial(jax.jit, static_argnames=("batch_blocks",))
def falcon_attention_forward(hidden_states, attention_mask, position_ids, params,
                             batch_blocks=1):
    """hidden_states: [B, S, HIDDEN] f32, attention_mask: [B, 1, S, S] additive,
    position_ids: [B, S] int32 (shared across batch). Returns [B, S, HIDDEN].
    On v7x pass batch_blocks=B so each TensorCore takes one batch element."""
    B, S, _ = hidden_states.shape
    # TODO(synk): per-batch position_ids would need per-batch cos/sin rows.
    pos = position_ids[0]
    cos = params["cos_cached"][pos]                     # [S, D]
    sin = params["sin_cached"][pos]                     # [S, D]

    # Head-tiled RoPE tables with the rotate_half sign and the lower/upper half
    # lane masks folded in; then replicated across batch rows.
    zeros_half = jnp.zeros_like(sin[:, :HALF])
    cos_t = jnp.tile(cos, (1, NUM_HEADS))
    sin_lo = jnp.tile(jnp.concatenate([-sin[:, :HALF], zeros_half], axis=-1),
                      (1, NUM_HEADS))
    sin_hi = jnp.tile(jnp.concatenate([zeros_half, sin[:, HALF:]], axis=-1),
                      (1, NUM_HEADS))
    cos_t = jnp.tile(cos_t, (B, 1))
    sin_lo = jnp.tile(sin_lo, (B, 1))
    sin_hi = jnp.tile(sin_hi, (B, 1))

    x2d = hidden_states.reshape(B * S, HIDDEN).astype(jnp.bfloat16)
    mask = attention_mask.reshape(B, S, S).astype(jnp.float32)
    out2d = falcon_attention_pallas(
        x2d, params["w_qkv_hm"], params["w_dense"],
        cos_t, sin_lo, sin_hi, mask, batch_blocks=batch_blocks)
    return out2d.reshape(B, S, HIDDEN)


# ----------------------------- pure-JAX reference ------------------------------
def reference_forward(hidden_states, attention_mask, position_ids, w_qkv, w_dense):
    """Mirrors the PyTorch eager path, computed at HIGHEST (true f32) precision."""
    B, S, _ = hidden_states.shape
    hp = lax.Precision.HIGHEST
    fused = jnp.matmul(hidden_states, w_qkv, precision=hp)
    fused = fused.reshape(B, S, NUM_HEADS, 3, HEAD_DIM)
    q = fused[..., 0, :].transpose(0, 2, 1, 3)
    k = fused[..., 1, :].transpose(0, 2, 1, 3)
    v = fused[..., 2, :].transpose(0, 2, 1, 3)

    cos, sin = rotary_tables(S, HEAD_DIM, ROPE_THETA)
    cos_sel = cos[position_ids][:, None, :, :]
    sin_sel = sin[position_ids][:, None, :, :]

    def rot(x):
        x1, x2 = x[..., :HALF], x[..., HALF:]
        return jnp.concatenate([-x2, x1], axis=-1)

    q = q * cos_sel + rot(q) * sin_sel
    k = k * cos_sel + rot(k) * sin_sel

    scores = jnp.einsum("bhqd,bhkd->bhqk", q, k, precision=hp) / math.sqrt(HEAD_DIM)
    probs = jax.nn.softmax(scores + attention_mask, axis=-1)
    attn = jnp.einsum("bhqk,bhkd->bhqd", probs, v, precision=hp)
    attn = attn.transpose(0, 2, 1, 3).reshape(B, S, HIDDEN)
    return jnp.matmul(attn, w_dense, precision=hp)


# ----------------------------- main --------------------------------------------
if __name__ == "__main__":
    key = jax.random.PRNGKey(0)
    k_x, k_qkv, k_dense = jax.random.split(key, 3)

    hidden_states = jax.random.normal(k_x, (BATCH, SEQ, HIDDEN), dtype=jnp.float32)

    w_qkv = jax.random.normal(k_qkv, (HIDDEN, QKV_OUT), dtype=jnp.float32) * (
        1.0 / math.sqrt(HIDDEN))
    w_dense = jax.random.normal(k_dense, (HIDDEN, HIDDEN), dtype=jnp.float32) * (
        1.0 / math.sqrt(HIDDEN))

    params = build_params(w_qkv, w_dense, max_seq=SEQ)

    # causal additive attention mask [B, 1, S, S]: 0 where allowed, -1e9 masked.
    causal = jnp.tril(jnp.ones((SEQ, SEQ), dtype=jnp.bool_))
    attention_mask = jnp.where(causal, 0.0, -1e9).astype(jnp.float32)
    attention_mask = jnp.broadcast_to(attention_mask, (BATCH, 1, SEQ, SEQ))

    position_ids = jnp.broadcast_to(jnp.arange(SEQ, dtype=jnp.int32), (BATCH, SEQ))

    out = falcon_attention_forward(hidden_states, attention_mask, position_ids, params)
    out = jax.block_until_ready(out)

    ref = reference_forward(hidden_states, attention_mask, position_ids, w_qkv, w_dense)
    assert out.shape == (BATCH, SEQ, HIDDEN)
    # Tolerance reflects bf16 MXU operands (f32 accumulation) vs. an exact-f32
    # reference; softmax / RoPE / normalization are computed exactly in f32.
    assert jnp.allclose(out, ref, atol=3e-2, rtol=3e-2), "mismatch vs reference"

    print("KERNEL_OK")
</pallas_src>

<mosaic_0001>
module attributes {stable_mosaic.version = 11 : i64} {
  func.func @_falcon_attn_kernel(%arg0: i32, %arg1: memref<16x32xbf16, #tpu.memory_space<vmem>>, %arg2: memref<32x96xbf16, #tpu.memory_space<vmem>>, %arg3: memref<32x32xbf16, #tpu.memory_space<vmem>>, %arg4: memref<16x32xf32, #tpu.memory_space<vmem>>, %arg5: memref<16x32xf32, #tpu.memory_space<vmem>>, %arg6: memref<16x32xf32, #tpu.memory_space<vmem>>, %arg7: memref<2x8x8xf32, #tpu.memory_space<vmem>>, %arg8: memref<16x32xf32, #tpu.memory_space<vmem>>, %arg9: memref<16x32xf32, #tpu.memory_space<vmem>>) attributes {dimension_semantics = [#tpu.dimension_semantics<parallel>], iteration_bounds = array<i64: 1>, scalar_prefetch = 0 : i64, scratch_operands = 1 : i64, tpu.core_type = #tpu.core_type<tc>, window_params = [{transform_indices = @transform_0, window_bounds = array<i64: 16, 32>}, {pipeline_mode = #tpu.pipeline_mode<synchronous>, transform_indices = @transform_1, window_bounds = array<i64: 32, 96>}, {pipeline_mode = #tpu.pipeline_mode<synchronous>, transform_indices = @transform_2, window_bounds = array<i64: 32, 32>}, {transform_indices = @transform_3, window_bounds = array<i64: 16, 32>}, {transform_indices = @transform_4, window_bounds = array<i64: 16, 32>}, {transform_indices = @transform_5, window_bounds = array<i64: 16, 32>}, {transform_indices = @transform_6, window_bounds = array<i64: 2, 8, 8>}, {transform_indices = @transform_7, window_bounds = array<i64: 16, 32>}]} {
    %c0 = arith.constant 0 : index
    %c0_0 = arith.constant 0 : index
    %0 = vector.load %arg1[%c0, %c0_0] : memref<16x32xbf16, #tpu.memory_space<vmem>>, vector<16x32xbf16>
    %c0_1 = arith.constant 0 : index
    %c0_2 = arith.constant 0 : index
    %1 = vector.load %arg2[%c0_1, %c0_2] : memref<32x96xbf16, #tpu.memory_space<vmem>>, vector<32x96xbf16>
    %cst = arith.constant dense<0.000000e+00> : vector<16x96xf32>
    %2 = tpu.matmul %0, %1, %cst {dimension_numbers = #tpu.dot_dimension_numbers<[1], [0], [0], [1], [0, 0, 1, 1], [], []>} : vector<16x32xbf16>, vector<32x96xbf16>, vector<16x96xf32> -> vector<16x96xf32>
    %3 = vector.extract_strided_slice %2 {offsets = [0, 0], sizes = [16, 32], strides = [1, 1]} : vector<16x96xf32> to vector<16x32xf32>
    %4 = vector.extract_strided_slice %2 {offsets = [0, 32], sizes = [16, 32], strides = [1, 1]} : vector<16x96xf32> to vector<16x32xf32>
    %5 = vector.extract_strided_slice %2 {offsets = [0, 64], sizes = [16, 32], strides = [1, 1]} : vector<16x96xf32> to vector<16x32xf32>
    %c0_3 = arith.constant 0 : index
    %c0_4 = arith.constant 0 : index
    %6 = vector.load %arg4[%c0_3, %c0_4] : memref<16x32xf32, #tpu.memory_space<vmem>>, vector<16x32xf32>
    %c0_5 = arith.constant 0 : index
    %c0_6 = arith.constant 0 : index
    %7 = vector.load %arg5[%c0_5, %c0_6] : memref<16x32xf32, #tpu.memory_space<vmem>>, vector<16x32xf32>
    %c0_7 = arith.constant 0 : index
    %c0_8 = arith.constant 0 : index
    %8 = vector.load %arg6[%c0_7, %c0_8] : memref<16x32xf32, #tpu.memory_space<vmem>>, vector<16x32xf32>
    %9 = vector.extract_strided_slice %3 {offsets = [0, 4], sizes = [16, 28], strides = [1, 1]} : vector<16x32xf32> to vector<16x28xf32>
    %10 = vector.extract_strided_slice %3 {offsets = [0, 0], sizes = [16, 4], strides = [1, 1]} : vector<16x32xf32> to vector<16x4xf32>
    %11 = tpu.concatenate %9, %10 in 1 : vector<16x28xf32>, vector<16x4xf32> -> vector<16x32xf32>
    %12 = vector.extract_strided_slice %3 {offsets = [0, 28], sizes = [16, 4], strides = [1, 1]} : vector<16x32xf32> to vector<16x4xf32>
    %13 = vector.extract_strided_slice %3 {offsets = [0, 0], sizes = [16, 28], strides = [1, 1]} : vector<16x32xf32> to vector<16x28xf32>
    %14 = tpu.concatenate %12, %13 in 1 : vector<16x4xf32>, vector<16x28xf32> -> vector<16x32xf32>
    %15 = arith.mulf %3, %6 : vector<16x32xf32>
    %16 = arith.mulf %11, %7 : vector<16x32xf32>
    %17 = arith.addf %15, %16 : vector<16x32xf32>
    %18 = arith.mulf %14, %8 : vector<16x32xf32>
    %19 = arith.addf %17, %18 : vector<16x32xf32>
    %cst_9 = arith.constant 0.353553385 : f32
    %20 = vector.broadcast %cst_9 : f32 to vector<16x32xf32>
    %21 = arith.mulf %19, %20 : vector<16x32xf32>
    %22 = vector.extract_strided_slice %4 {offsets = [0, 4], sizes = [16, 28], strides = [1, 1]} : vector<16x32xf32> to vector<16x28xf32>
    %23 = vector.extract_strided_slice %4 {offsets = [0, 0], sizes = [16, 4], strides = [1, 1]} : vector<16x32xf32> to vector<16x4xf32>
    %24 = tpu.concatenate %22, %23 in 1 : vector<16x28xf32>, vector<16x4xf32> -> vector<16x32xf32>
    %25 = vector.extract_strided_slice %4 {offsets = [0, 28], sizes = [16, 4], strides = [1, 1]} : vector<16x32xf32> to vector<16x4xf32>
    %26 = vector.extract_strided_slice %4 {offsets = [0, 0], sizes = [16, 28], strides = [1, 1]} : vector<16x32xf32> to vector<16x28xf32>
    %27 = tpu.concatenate %25, %26 in 1 : vector<16x4xf32>, vector<16x28xf32> -> vector<16x32xf32>
    %28 = arith.mulf %4, %6 : vector<16x32xf32>
    %29 = arith.mulf %24, %7 : vector<16x32xf32>
    %30 = arith.addf %28, %29 : vector<16x32xf32>
    %31 = arith.mulf %27, %8 : vector<16x32xf32>
    %32 = arith.addf %30, %31 : vector<16x32xf32>
    %33 = arith.truncf %21 : vector<16x32xf32> to vector<16x32xbf16>
    %34 = arith.truncf %32 : vector<16x32xf32> to vector<16x32xbf16>
    %35 = arith.truncf %5 : vector<16x32xf32> to vector<16x32xbf16>
    %c0_10 = arith.constant 0 : index
    %c0_11 = arith.constant 0 : index
    %c0_12 = arith.constant 0 : index
    %36 = vector.load %arg7[%c0_10, %c0_11, %c0_12] : memref<2x8x8xf32, #tpu.memory_space<vmem>>, vector<1x8x8xf32>
    %37 = vector.shape_cast %36 : vector<1x8x8xf32> to vector<8x8xf32>
    %38 = vector.extract_strided_slice %33 {offsets = [0, 0], sizes = [8, 8], strides = [1, 1]} : vector<16x32xbf16> to vector<8x8xbf16>
    %39 = vector.extract_strided_slice %34 {offsets = [0, 0], sizes = [8, 8], strides = [1, 1]} : vector<16x32xbf16> to vector<8x8xbf16>
    %40 = vector.extract_strided_slice %35 {offsets = [0, 0], sizes = [8, 8], strides = [1, 1]} : vector<16x32xbf16> to vector<8x8xbf16>
    %cst_13 = arith.constant dense<0.000000e+00> : vector<8x8xf32>
    %41 = tpu.matmul %38, %39, %cst_13 {dimension_numbers = #tpu.dot_dimension_numbers<[1], [1], [0], [0], [0, 0, 1, 0], [], []>} : vector<8x8xbf16>, vector<8x8xbf16>, vector<8x8xf32> -> vector<8x8xf32>
    %42 = arith.addf %41, %37 : vector<8x8xf32>
    %cst_14 = arith.constant dense<0xFF800000> : vector<8xf32>
    %43 = vector.multi_reduction <maximumf>, %42, %cst_14 [1] : vector<8x8xf32> to vector<8xf32>
    %44 = vector.shape_cast %43 : vector<8xf32> to vector<8x1xf32>
    %45 = vector.broadcast %44 : vector<8x1xf32> to vector<8x8xf32>
    %46 = arith.subf %42, %45 : vector<8x8xf32>
    %47 = math.exp %46 : vector<8x8xf32>
    %cst_15 = arith.constant dense<0.000000e+00> : vector<8xf32>
    %48 = vector.multi_reduction <add>, %47, %cst_15 [1] : vector<8x8xf32> to vector<8xf32>
    %49 = vector.shape_cast %48 : vector<8xf32> to vector<8x1xf32>
    %cst_16 = arith.constant 1.000000e+00 : f32
    %50 = vector.broadcast %cst_16 : f32 to vector<8x1xf32>
    %51 = arith.divf %50, %49 : vector<8x1xf32>
    %52 = arith.truncf %47 : vector<8x8xf32> to vector<8x8xbf16>
    %cst_17 = arith.constant dense<0.000000e+00> : vector<8x8xf32>
    %53 = tpu.matmul %52, %40, %cst_17 {dimension_numbers = #tpu.dot_dimension_numbers<[1], [0], [0], [1], [0, 0, 1, 1], [], []>} : vector<8x8xbf16>, vector<8x8xbf16>, vector<8x8xf32> -> vector<8x8xf32>
    %54 = vector.broadcast %51 : vector<8x1xf32> to vector<8x8xf32>
    %55 = arith.mulf %53, %54 : vector<8x8xf32>
    %c0_18 = arith.constant 0 : index
    %c0_19 = arith.constant 0 : index
    %56 = vector.load %arg9[%c0_18, %c0_19] : memref<16x32xf32, #tpu.memory_space<vmem>>, vector<8x8xf32>
    tpu.vector_store %arg9[%c0_18, %c0_19], %55 {strides = array<i32>} : memref<16x32xf32, #tpu.memory_space<vmem>>, vector<8x8xf32>,
    %57 = vector.extract_strided_slice %33 {offsets = [0, 8], sizes = [8, 8], strides = [1, 1]} : vector<16x32xbf16> to vector<8x8xbf16>
    %58 = vector.extract_strided_slice %34 {offsets = [0, 8], sizes = [8, 8], strides = [1, 1]} : vector<16x32xbf16> to vector<8x8xbf16>
    %59 = vector.extract_strided_slice %35 {offsets = [0, 8], sizes = [8, 8], strides = [1, 1]} : vector<16x32xbf16> to vector<8x8xbf16>
    %cst_20 = arith.constant dense<0.000000e+00> : vector<8x8xf32>
    %60 = tpu.matmul %57, %58, %cst_20 {dimension_numbers = #tpu.dot_dimension_numbers<[1], [1], [0], [0], [0, 0, 1, 0], [], []>} : vector<8x8xbf16>, vector<8x8xbf16>, vector<8x8xf32> -> vector<8x8xf32>
    %61 = arith.addf %60, %37 : vector<8x8xf32>
    %cst_21 = arith.constant dense<0xFF800000> : vector<8xf32>
    %62 = vector.multi_reduction <maximumf>, %61, %cst_21 [1] : vector<8x8xf32> to vector<8xf32>
    %63 = vector.shape_cast %62 : vector<8xf32> to vector<8x1xf32>
    %64 = vector.broadcast %63 : vector<8x1xf32> to vector<8x8xf32>
    %65 = arith.subf %61, %64 : vector<8x8xf32>
    %66 = math.exp %65 : vector<8x8xf32>
    %cst_22 = arith.constant dense<0.000000e+00> : vector<8xf32>
    %67 = vector.multi_reduction <add>, %66, %cst_22 [1] : vector<8x8xf32> to vector<8xf32>
    %68 = vector.shape_cast %67 : vector<8xf32> to vector<8x1xf32>
    %cst_23 = arith.constant 1.000000e+00 : f32
    %69 = vector.broadcast %cst_23 : f32 to vector<8x1xf32>
    %70 = arith.divf %69, %68 : vector<8x1xf32>
    %71 = arith.truncf %66 : vector<8x8xf32> to vector<8x8xbf16>
    %cst_24 = arith.constant dense<0.000000e+00> : vector<8x8xf32>
    %72 = tpu.matmul %71, %59, %cst_24 {dimension_numbers = #tpu.dot_dimension_numbers<[1], [0], [0], [1], [0, 0, 1, 1], [], []>} : vector<8x8xbf16>, vector<8x8xbf16>, vector<8x8xf32> -> vector<8x8xf32>
    %73 = vector.broadcast %70 : vector<8x1xf32> to vector<8x8xf32>
    %74 = arith.mulf %72, %73 : vector<8x8xf32>
    %c0_25 = arith.constant 0 : index
    %c8 = arith.constant 8 : index
    %75 = vector.load %arg9[%c0_25, %c8] : memref<16x32xf32, #tpu.memory_space<vmem>>, vector<8x8xf32>
    tpu.vector_store %arg9[%c0_25, %c8], %74 {strides = array<i32>} : memref<16x32xf32, #tpu.memory_space<vmem>>, vector<8x8xf32>,
    %76 = vector.extract_strided_slice %33 {offsets = [0, 16], sizes = [8, 8], strides = [1, 1]} : vector<16x32xbf16> to vector<8x8xbf16>
    %77 = vector.extract_strided_slice %34 {offsets = [0, 16], sizes = [8, 8], strides = [1, 1]} : vector<16x32xbf16> to vector<8x8xbf16>
    %78 = vector.extract_strided_slice %35 {offsets = [0, 16], sizes = [8, 8], strides = [1, 1]} : vector<16x32xbf16> to vector<8x8xbf16>
    %cst_26 = arith.constant dense<0.000000e+00> : vector<8x8xf32>
    %79 = tpu.matmul %76, %77, %cst_26 {dimension_numbers = #tpu.dot_dimension_numbers<[1], [1], [0], [0], [0, 0, 1, 0], [], []>} : vector<8x8xbf16>, vector<8x8xbf16>, vector<8x8xf32> -> vector<8x8xf32>
    %80 = arith.addf %79, %37 : vector<8x8xf32>
    %cst_27 = arith.constant dense<0xFF800000> : vector<8xf32>
    %81 = vector.multi_reduction <maximumf>, %80, %cst_27 [1] : vector<8x8xf32> to vector<8xf32>
    %82 = vector.shape_cast %81 : vector<8xf32> to vector<8x1xf32>
    %83 = vector.broadcast %82 : vector<8x1xf32> to vector<8x8xf32>
    %84 = arith.subf %80, %83 : vector<8x8xf32>
    %85 = math.exp %84 : vector<8x8xf32>
    %cst_28 = arith.constant dense<0.000000e+00> : vector<8xf32>
    %86 = vector.multi_reduction <add>, %85, %cst_28 [1] : vector<8x8xf32> to vector<8xf32>
    %87 = vector.shape_cast %86 : vector<8xf32> to vector<8x1xf32>
    %cst_29 = arith.constant 1.000000e+00 : f32
    %88 = vector.broadcast %cst_29 : f32 to vector<8x1xf32>
    %89 = arith.divf %88, %87 : vector<8x1xf32>
    %90 = arith.truncf %85 : vector<8x8xf32> to vector<8x8xbf16>
    %cst_30 = arith.constant dense<0.000000e+00> : vector<8x8xf32>
    %91 = tpu.matmul %90, %78, %cst_30 {dimension_numbers = #tpu.dot_dimension_numbers<[1], [0], [0], [1], [0, 0, 1, 1], [], []>} : vector<8x8xbf16>, vector<8x8xbf16>, vector<8x8xf32> -> vector<8x8xf32>
    %92 = vector.broadcast %89 : vector<8x1xf32> to vector<8x8xf32>
    %93 = arith.mulf %91, %92 : vector<8x8xf32>
    %c0_31 = arith.constant 0 : index
    %c16 = arith.constant 16 : index
    %94 = vector.load %arg9[%c0_31, %c16] : memref<16x32xf32, #tpu.memory_space<vmem>>, vector<8x8xf32>
    tpu.vector_store %arg9[%c0_31, %c16], %93 {strides = array<i32>} : memref<16x32xf32, #tpu.memory_space<vmem>>, vector<8x8xf32>,
    %95 = vector.extract_strided_slice %33 {offsets = [0, 24], sizes = [8, 8], strides = [1, 1]} : vector<16x32xbf16> to vector<8x8xbf16>
    %96 = vector.extract_strided_slice %34 {offsets = [0, 24], sizes = [8, 8], strides = [1, 1]} : vector<16x32xbf16> to vector<8x8xbf16>
    %97 = vector.extract_strided_slice %35 {offsets = [0, 24], sizes = [8, 8], strides = [1, 1]} : vector<16x32xbf16> to vector<8x8xbf16>
    %cst_32 = arith.constant dense<0.000000e+00> : vector<8x8xf32>
    %98 = tpu.matmul %95, %96, %cst_32 {dimension_numbers = #tpu.dot_dimension_numbers<[1], [1], [0], [0], [0, 0, 1, 0], [], []>} : vector<8x8xbf16>, vector<8x8xbf16>, vector<8x8xf32> -> vector<8x8xf32>
    %99 = arith.addf %98, %37 : vector<8x8xf32>
    %cst_33 = arith.constant dense<0xFF800000> : vector<8xf32>
    %100 = vector.multi_reduction <maximumf>, %99, %cst_33 [1] : vector<8x8xf32> to vector<8xf32>
    %101 = vector.shape_cast %100 : vector<8xf32> to vector<8x1xf32>
    %102 = vector.broadcast %101 : vector<8x1xf32> to vector<8x8xf32>
    %103 = arith.subf %99, %102 : vector<8x8xf32>
    %104 = math.exp %103 : vector<8x8xf32>
    %cst_34 = arith.constant dense<0.000000e+00> : vector<8xf32>
    %105 = vector.multi_reduction <add>, %104, %cst_34 [1] : vector<8x8xf32> to vector<8xf32>
    %106 = vector.shape_cast %105 : vector<8xf32> to vector<8x1xf32>
    %cst_35 = arith.constant 1.000000e+00 : f32
    %107 = vector.broadcast %cst_35 : f32 to vector<8x1xf32>
    %108 = arith.divf %107, %106 : vector<8x1xf32>
    %109 = arith.truncf %104 : vector<8x8xf32> to vector<8x8xbf16>
    %cst_36 = arith.constant dense<0.000000e+00> : vector<8x8xf32>
    %110 = tpu.matmul %109, %97, %cst_36 {dimension_numbers = #tpu.dot_dimension_numbers<[1], [0], [0], [1], [0, 0, 1, 1], [], []>} : vector<8x8xbf16>, vector<8x8xbf16>, vector<8x8xf32> -> vector<8x8xf32>
    %111 = vector.broadcast %108 : vector<8x1xf32> to vector<8x8xf32>
    %112 = arith.mulf %110, %111 : vector<8x8xf32>
    %c0_37 = arith.constant 0 : index
    %c24 = arith.constant 24 : index
    %113 = vector.load %arg9[%c0_37, %c24] : memref<16x32xf32, #tpu.memory_space<vmem>>, vector<8x8xf32>
    tpu.vector_store %arg9[%c0_37, %c24], %112 {strides = array<i32>} : memref<16x32xf32, #tpu.memory_space<vmem>>, vector<8x8xf32>,
    %c1 = arith.constant 1 : index
    %c0_38 = arith.constant 0 : index
    %c0_39 = arith.constant 0 : index
    %114 = vector.load %arg7[%c1, %c0_38, %c0_39] : memref<2x8x8xf32, #tpu.memory_space<vmem>>, vector<1x8x8xf32>
    %115 = vector.shape_cast %114 : vector<1x8x8xf32> to vector<8x8xf32>
    %116 = vector.extract_strided_slice %33 {offsets = [8, 0], sizes = [8, 8], strides = [1, 1]} : vector<16x32xbf16> to vector<8x8xbf16>
    %117 = vector.extract_strided_slice %34 {offsets = [8, 0], sizes = [8, 8], strides = [1, 1]} : vector<16x32xbf16> to vector<8x8xbf16>
    %118 = vector.extract_strided_slice %35 {offsets = [8, 0], sizes = [8, 8], strides = [1, 1]} : vector<16x32xbf16> to vector<8x8xbf16>
    %cst_40 = arith.constant dense<0.000000e+00> : vector<8x8xf32>
    %119 = tpu.matmul %116, %117, %cst_40 {dimension_numbers = #tpu.dot_dimension_numbers<[1], [1], [0], [0], [0, 0, 1, 0], [], []>} : vector<8x8xbf16>, vector<8x8xbf16>, vector<8x8xf32> -> vector<8x8xf32>
    %120 = arith.addf %119, %115 : vector<8x8xf32>
    %cst_41 = arith.constant dense<0xFF800000> : vector<8xf32>
    %121 = vector.multi_reduction <maximumf>, %120, %cst_41 [1] : vector<8x8xf32> to vector<8xf32>
    %122 = vector.shape_cast %121 : vector<8xf32> to vector<8x1xf32>
    %123 = vector.broadcast %122 : vector<8x1xf32> to vector<8x8xf32>
    %124 = arith.subf %120, %123 : vector<8x8xf32>
    %125 = math.exp %124 : vector<8x8xf32>
    %cst_42 = arith.constant dense<0.000000e+00> : vector<8xf32>
    %126 = vector.multi_reduction <add>, %125, %cst_42 [1] : vector<8x8xf32> to vector<8xf32>
    %127 = vector.shape_cast %126 : vector<8xf32> to vector<8x1xf32>
    %cst_43 = arith.constant 1.000000e+00 : f32
    %128 = vector.broadcast %cst_43 : f32 to vector<8x1xf32>
    %129 = arith.divf %128, %127 : vector<8x1xf32>
    %130 = arith.truncf %125 : vector<8x8xf32> to vector<8x8xbf16>
    %cst_44 = arith.constant dense<0.000000e+00> : vector<8x8xf32>
    %131 = tpu.matmul %130, %118, %cst_44 {dimension_numbers = #tpu.dot_dimension_numbers<[1], [0], [0], [1], [0, 0, 1, 1], [], []>} : vector<8x8xbf16>, vector<8x8xbf16>, vector<8x8xf32> -> vector<8x8xf32>
    %132 = vector.broadcast %129 : vector<8x1xf32> to vector<8x8xf32>
    %133 = arith.mulf %131, %132 : vector<8x8xf32>
    %c8_45 = arith.constant 8 : index
    %c0_46 = arith.constant 0 : index
    %134 = vector.load %arg9[%c8_45, %c0_46] : memref<16x32xf32, #tpu.memory_space<vmem>>, vector<8x8xf32>
    tpu.vector_store %arg9[%c8_45, %c0_46], %133 {strides = array<i32>} : memref<16x32xf32, #tpu.memory_space<vmem>>, vector<8x8xf32>,
    %135 = vector.extract_strided_slice %33 {offsets = [8, 8], sizes = [8, 8], strides = [1, 1]} : vector<16x32xbf16> to vector<8x8xbf16>
    %136 = vector.extract_strided_slice %34 {offsets = [8, 8], sizes = [8, 8], strides = [1, 1]} : vector<16x32xbf16> to vector<8x8xbf16>
    %137 = vector.extract_strided_slice %35 {offsets = [8, 8], sizes = [8, 8], strides = [1, 1]} : vector<16x32xbf16> to vector<8x8xbf16>
    %cst_47 = arith.constant dense<0.000000e+00> : vector<8x8xf32>
    %138 = tpu.matmul %135, %136, %cst_47 {dimension_numbers = #tpu.dot_dimension_numbers<[1], [1], [0], [0], [0, 0, 1, 0], [], []>} : vector<8x8xbf16>, vector<8x8xbf16>, vector<8x8xf32> -> vector<8x8xf32>
    %139 = arith.addf %138, %115 : vector<8x8xf32>
    %cst_48 = arith.constant dense<0xFF800000> : vector<8xf32>
    %140 = vector.multi_reduction <maximumf>, %139, %cst_48 [1] : vector<8x8xf32> to vector<8xf32>
    %141 = vector.shape_cast %140 : vector<8xf32> to vector<8x1xf32>
    %142 = vector.broadcast %141 : vector<8x1xf32> to vector<8x8xf32>
    %143 = arith.subf %139, %142 : vector<8x8xf32>
    %144 = math.exp %143 : vector<8x8xf32>
    %cst_49 = arith.constant dense<0.000000e+00> : vector<8xf32>
    %145 = vector.multi_reduction <add>, %144, %cst_49 [1] : vector<8x8xf32> to vector<8xf32>
    %146 = vector.shape_cast %145 : vector<8xf32> to vector<8x1xf32>
    %cst_50 = arith.constant 1.000000e+00 : f32
    %147 = vector.broadcast %cst_50 : f32 to vector<8x1xf32>
    %148 = arith.divf %147, %146 : vector<8x1xf32>
    %149 = arith.truncf %144 : vector<8x8xf32> to vector<8x8xbf16>
    %cst_51 = arith.constant dense<0.000000e+00> : vector<8x8xf32>
    %150 = tpu.matmul %149, %137, %cst_51 {dimension_numbers = #tpu.dot_dimension_numbers<[1], [0], [0], [1], [0, 0, 1, 1], [], []>} : vector<8x8xbf16>, vector<8x8xbf16>, vector<8x8xf32> -> vector<8x8xf32>
    %151 = vector.broadcast %148 : vector<8x1xf32> to vector<8x8xf32>
    %152 = arith.mulf %150, %151 : vector<8x8xf32>
    %c8_52 = arith.constant 8 : index
    %c8_53 = arith.constant 8 : index
    %153 = vector.load %arg9[%c8_52, %c8_53] : memref<16x32xf32, #tpu.memory_space<vmem>>, vector<8x8xf32>
    tpu.vector_store %arg9[%c8_52, %c8_53], %152 {strides = array<i32>} : memref<16x32xf32, #tpu.memory_space<vmem>>, vector<8x8xf32>,
    %154 = vector.extract_strided_slice %33 {offsets = [8, 16], sizes = [8, 8], strides = [1, 1]} : vector<16x32xbf16> to vector<8x8xbf16>
    %155 = vector.extract_strided_slice %34 {offsets = [8, 16], sizes = [8, 8], strides = [1, 1]} : vector<16x32xbf16> to vector<8x8xbf16>
    %156 = vector.extract_strided_slice %35 {offsets = [8, 16], sizes = [8, 8], strides = [1, 1]} : vector<16x32xbf16> to vector<8x8xbf16>
    %cst_54 = arith.constant dense<0.000000e+00> : vector<8x8xf32>
    %157 = tpu.matmul %154, %155, %cst_54 {dimension_numbers = #tpu.dot_dimension_numbers<[1], [1], [0], [0], [0, 0, 1, 0], [], []>} : vector<8x8xbf16>, vector<8x8xbf16>, vector<8x8xf32> -> vector<8x8xf32>
    %158 = arith.addf %157, %115 : vector<8x8xf32>
    %cst_55 = arith.constant dense<0xFF800000> : vector<8xf32>
    %159 = vector.multi_reduction <maximumf>, %158, %cst_55 [1] : vector<8x8xf32> to vector<8xf32>
    %160 = vector.shape_cast %159 : vector<8xf32> to vector<8x1xf32>
    %161 = vector.broadcast %160 : vector<8x1xf32> to vector<8x8xf32>
    %162 = arith.subf %158, %161 : vector<8x8xf32>
    %163 = math.exp %162 : vector<8x8xf32>
    %cst_56 = arith.constant dense<0.000000e+00> : vector<8xf32>
    %164 = vector.multi_reduction <add>, %163, %cst_56 [1] : vector<8x8xf32> to vector<8xf32>
    %165 = vector.shape_cast %164 : vector<8xf32> to vector<8x1xf32>
    %cst_57 = arith.constant 1.000000e+00 : f32
    %166 = vector.broadcast %cst_57 : f32 to vector<8x1xf32>
    %167 = arith.divf %166, %165 : vector<8x1xf32>
    %168 = arith.truncf %163 : vector<8x8xf32> to vector<8x8xbf16>
    %cst_58 = arith.constant dense<0.000000e+00> : vector<8x8xf32>
    %169 = tpu.matmul %168, %156, %cst_58 {dimension_numbers = #tpu.dot_dimension_numbers<[1], [0], [0], [1], [0, 0, 1, 1], [], []>} : vector<8x8xbf16>, vector<8x8xbf16>, vector<8x8xf32> -> vector<8x8xf32>
    %170 = vector.broadcast %167 : vector<8x1xf32> to vector<8x8xf32>
    %171 = arith.mulf %169, %170 : vector<8x8xf32>
    %c8_59 = arith.constant 8 : index
    %c16_60 = arith.constant 16 : index
    %172 = vector.load %arg9[%c8_59, %c16_60] : memref<16x32xf32, #tpu.memory_space<vmem>>, vector<8x8xf32>
    tpu.vector_store %arg9[%c8_59, %c16_60], %171 {strides = array<i32>} : memref<16x32xf32, #tpu.memory_space<vmem>>, vector<8x8xf32>,
    %173 = vector.extract_strided_slice %33 {offsets = [8, 24], sizes = [8, 8], strides = [1, 1]} : vector<16x32xbf16> to vector<8x8xbf16>
    %174 = vector.extract_strided_slice %34 {offsets = [8, 24], sizes = [8, 8], strides = [1, 1]} : vector<16x32xbf16> to vector<8x8xbf16>
    %175 = vector.extract_strided_slice %35 {offsets = [8, 24], sizes = [8, 8], strides = [1, 1]} : vector<16x32xbf16> to vector<8x8xbf16>
    %cst_61 = arith.constant dense<0.000000e+00> : vector<8x8xf32>
    %176 = tpu.matmul %173, %174, %cst_61 {dimension_numbers = #tpu.dot_dimension_numbers<[1], [1], [0], [0], [0, 0, 1, 0], [], []>} : vector<8x8xbf16>, vector<8x8xbf16>, vector<8x8xf32> -> vector<8x8xf32>
    %177 = arith.addf %176, %115 : vector<8x8xf32>
    %cst_62 = arith.constant dense<0xFF800000> : vector<8xf32>
    %178 = vector.multi_reduction <maximumf>, %177, %cst_62 [1] : vector<8x8xf32> to vector<8xf32>
    %179 = vector.shape_cast %178 : vector<8xf32> to vector<8x1xf32>
    %180 = vector.broadcast %179 : vector<8x1xf32> to vector<8x8xf32>
    %181 = arith.subf %177, %180 : vector<8x8xf32>
    %182 = math.exp %181 : vector<8x8xf32>
    %cst_63 = arith.constant dense<0.000000e+00> : vector<8xf32>
    %183 = vector.multi_reduction <add>, %182, %cst_63 [1] : vector<8x8xf32> to vector<8xf32>
    %184 = vector.shape_cast %183 : vector<8xf32> to vector<8x1xf32>
    %cst_64 = arith.constant 1.000000e+00 : f32
    %185 = vector.broadcast %cst_64 : f32 to vector<8x1xf32>
    %186 = arith.divf %185, %184 : vector<8x1xf32>
    %187 = arith.truncf %182 : vector<8x8xf32> to vector<8x8xbf16>
    %cst_65 = arith.constant dense<0.000000e+00> : vector<8x8xf32>
    %188 = tpu.matmul %187, %175, %cst_65 {dimension_numbers = #tpu.dot_dimension_numbers<[1], [0], [0], [1], [0, 0, 1, 1], [], []>} : vector<8x8xbf16>, vector<8x8xbf16>, vector<8x8xf32> -> vector<8x8xf32>
    %189 = vector.broadcast %186 : vector<8x1xf32> to vector<8x8xf32>
    %190 = arith.mulf %188, %189 : vector<8x8xf32>
    %c8_66 = arith.constant 8 : index
    %c24_67 = arith.constant 24 : index
    %191 = vector.load %arg9[%c8_66, %c24_67] : memref<16x32xf32, #tpu.memory_space<vmem>>, vector<8x8xf32>
    tpu.vector_store %arg9[%c8_66, %c24_67], %190 {strides = array<i32>} : memref<16x32xf32, #tpu.memory_space<vmem>>, vector<8x8xf32>,
    %c0_68 = arith.constant 0 : index
    %c0_69 = arith.constant 0 : index
    %192 = vector.load %arg9[%c0_68, %c0_69] : memref<16x32xf32, #tpu.memory_space<vmem>>, vector<16x32xf32>
    %193 = arith.truncf %192 : vector<16x32xf32> to vector<16x32xbf16>
    %c0_70 = arith.constant 0 : index
    %c0_71 = arith.constant 0 : index
    %194 = vector.load %arg3[%c0_70, %c0_71] : memref<32x32xbf16, #tpu.memory_space<vmem>>, vector<32x32xbf16>
    %cst_72 = arith.constant dense<0.000000e+00> : vector<16x32xf32>
    %195 = tpu.matmul %193, %194, %cst_72 {dimension_numbers = #tpu.dot_dimension_numbers<[1], [0], [0], [1], [0, 0, 1, 1], [], []>} : vector<16x32xbf16>, vector<32x32xbf16>, vector<16x32xf32> -> vector<16x32xf32>
    %c0_73 = arith.constant 0 : index
    %c0_74 = arith.constant 0 : index
    %196 = vector.load %arg8[%c0_73, %c0_74] : memref<16x32xf32, #tpu.memory_space<vmem>>, vector<16x32xf32>
    tpu.vector_store %arg8[%c0_73, %c0_74], %195 {strides = array<i32>} : memref<16x32xf32, #tpu.memory_space<vmem>>, vector<16x32xf32>,
    return
  }
  func.func @transform_0(%arg0: i32) -> (i32, i32) {
    %c0_i32 = arith.constant 0 : i32
    %c0_i32_0 = arith.constant 0 : i32
    return %arg0, %c0_i32 : i32, i32
  }
  func.func @transform_1(%arg0: i32) -> (i32, i32) {
    %c0_i32 = arith.constant 0 : i32
    %c0_i32_0 = arith.constant 0 : i32
    %c0_i32_1 = arith.constant 0 : i32
    return %c0_i32, %c0_i32_0 : i32, i32
  }
  func.func @transform_2(%arg0: i32) -> (i32, i32) {
    %c0_i32 = arith.constant 0 : i32
    %c0_i32_0 = arith.constant 0 : i32
    %c0_i32_1 = arith.constant 0 : i32
    return %c0_i32, %c0_i32_0 : i32, i32
  }
  func.func @transform_3(%arg0: i32) -> (i32, i32) {
    %c0_i32 = arith.constant 0 : i32
    %c0_i32_0 = arith.constant 0 : i32
    return %arg0, %c0_i32 : i32, i32
  }
  func.func @transform_4(%arg0: i32) -> (i32, i32) {
    %c0_i32 = arith.constant 0 : i32
    %c0_i32_0 = arith.constant 0 : i32
    return %arg0, %c0_i32 : i32, i32
  }
  func.func @transform_5(%arg0: i32) -> (i32, i32) {
    %c0_i32 = arith.constant 0 : i32
    %c0_i32_0 = arith.constant 0 : i32
    return %arg0, %c0_i32 : i32, i32
  }
  func.func @transform_6(%arg0: i32) -> (i32, i32, i32) {
    %c0_i32 = arith.constant 0 : i32
    %c0_i32_0 = arith.constant 0 : i32
    %c0_i32_1 = arith.constant 0 : i32
    return %arg0, %c0_i32, %c0_i32_0 : i32, i32, i32
  }
  func.func @transform_7(%arg0: i32) -> (i32, i32) {
    %c0_i32 = arith.constant 0 : i32
    %c0_i32_0 = arith.constant 0 : i32
    return %arg0, %c0_i32 : i32, i32
  }
}

</mosaic_0001>

<bundles_post_ra>
// kernel: falcon_attention_forward.1
= control target key start
LH: loop header
LB: loop body
LE: loop exit
PB: predicated region body
PF: predicated region fallthrough
CT: control target
= control target key end

     0   :  { %s1237_s0 = inlined_call_operand.vmem [shape: bf16[16,32], index: 0, kind: input, shape index: {}]   ;;  %s1238_s1 = inlined_call_operand.vmem [shape: bf16[32,96], index: 1, kind: input, shape index: {}]   ;;  %s1239_s2 = inlined_call_operand.vmem [shape: bf16[32,32], index: 2, kind: input, shape index: {}]   ;;  %s1240_s3 = inlined_call_operand.vmem [shape: f32[16,32], index: 3, kind: input, shape index: {}]   ;;  %s1241_s4 = inlined_call_operand.vmem [shape: f32[16,32], index: 4, kind: input, shape index: {}]   ;;  %s1242_s5 = inlined_call_operand.vmem [shape: f32[16,32], index: 5, kind: input, shape index: {}]   ;;  %s1243_s6 = inlined_call_operand.vmem [shape: f32[2,8,8], index: 6, kind: input, shape index: {}]   ;;  %s1244_s7 = inlined_call_operand.hbm [shape: f32[16,32], index: 7, kind: output, shape index: {}]  }
   0x1   :  { %v886_v0 = vld [vmem:[%s1238_s1 + $0x8] sm:$0xff]  ;;  %v69_v1 = vld [vmem:[%s1240_s3] sm:$0xff] }
   0x2   :  { %12 = vsyncpa [#allocation4], 0  ;;  %61 = vmatpush.bf16.msra.mxu0 %v886_v0  ;;  %v885_v2 = vld [vmem:[%s1238_s1] sm:$0xff]  ;;  %s970_s30 = smov 32   ;;  %vm51_vm0 = vcmask 261120   ;;  %s971_s10 = smov 100  }
   0x3   :  { %137 = vrot.lane.b32.xlu2 %v69_v1, %s970_s30  ;;  %v884_v3 = vld [vmem:[%s1237_s0] sm:$0xff]  ;;  %s972_s11 = smov 124   ;;  %s973_s1 = smov 68   ;;  %vm89_vm1 = vcmask 228352   ;;  %vm104_vm2 = vcmask 31744   ;;  %v72_v18 = vld [vmem:[%s1241_s4 + $0x8] sm:$0xff] }
   0x4   :  { %s974_s12 = smov 92   ;;  %s975_s0 = smov 28   ;;  %v71_v11 = vld [vmem:[%s1241_s4] sm:$0xff]  ;;  %v74_v23 = vld [vmem:[%s1242_s5 + $0x8] sm:$0xff]  ;;  %vm181_vm3 = vcmask 64512   ;;  %vm234_vm4 = vcmask 1043456  }
   0x5   :  { %s976_s13 = smov 4   ;;  %v73_v16 = vld [vmem:[%s1242_s5] sm:$0xff]  ;;  %v70_v29 = vld [vmem:[%s1240_s3 + $0x8] sm:$0xff]  ;;  %s977_s3 = smov 120  }
   0x6   :  { %62 = vmatpush.bf16.msra.mxu0 %v885_v2  ;;  %s978_s5 = smov 88   ;;  %s979_s23 = smov 96  }
   0x7   :  { %s980_s24 = smov 80   ;;  %s981_s25 = smov 72  }
   0x8   :  { %s982_s26 = smov 104   ;;  %s983_s27 = smov 112  }
   0x9   :  { %857 = vmatmul.msk.bf16.vlgmr.msra.gmra.mxu0 %vm51_vm0, %v884_v3  ;;  %s984_s28 = smov 64   ;;  %s985_s29 = smov 48  }
   0xa   :  { %s833_s20 = sshll.u32 %s1244_s7, 4  ;;  %s992_s21 = smov 128   ;;  %s834_s20 = int_to_ptr.hbm [resolvable:$true] %s833_s20 }
  0x5d   :  { %v138_v6 = vpop.permute.xlu2 %137 }
  0x86   :  { %v1047_v4 = vpop.f32.mrf.mxu0 }
  0x87   :  { %92 = vrot.lane.b32.xlu1 %v1047_v4, %s971_s10  ;;  %77 = vrot.lane.b32.xlu0 %v1047_v4, %s972_s11  ;;  %v107_v31 = vmul.f32 %v69_v1, %v1047_v4  ;;  %v143_v42 = vmul.f32 %v138_v6, %v1047_v4 }
  0x8e   :  { %v1051_v5 = vpop.f32.mrf.mxu0 }
  0x8f   :  { %127 = vrot.lane.b32.xlu1 %v1047_v4, %s973_s1  ;;  %119 = vrot.lane.b32.xlu0 %v1047_v4, %s974_s12  ;;  %v108_v60 = vmul.f32 %v70_v29, %v1051_v5 }
  0x90   :  { %79 = vrot.lane.b32.xlu2 %v1051_v5, %s972_s11 }
  0x97   :  { %121 = vrot.lane.b32.xlu0 %v1051_v5, %s974_s12  ;;  %s989_s12 = smov 16  }
  0x98   :  { %94 = vrot.lane.b32.xlu2 %v1051_v5, %s971_s10  ;;  %s987_s10 = smov 40  }
  0x9f   :  { %129 = vrot.lane.b32.xlu0 %v1051_v5, %s973_s1 }
  0xa0   :  { %83 = vrot.lane.b32.xlu2 %v1047_v4, %s975_s0 }
  0xa7   :  { %98 = vrot.lane.b32.xlu0 %v1047_v4, %s976_s13 }
  0xea   :  { %v1063_v9 = vpop.permute.xlu2 %79 }
  0xf2   :  { %v95_v15 = vpop.permute.xlu2 %94 }
  0xf9   :  { %v78_v7 = vpop.permute.xlu0 %77  ;;  %v93_v8 = vpop.permute.xlu1 %92 }
  0xfa   :  { %v84_v24 = vpop.permute.xlu2 %83 }
  0xfb   :  { %v90_v28 = vsel %vm89_vm1, %v78_v7, %v84_v24 }
  0xfc   :  { %v109_v30 = vmul.f32 %v90_v28, %v71_v11 }
  0xfe   :  { %v111_v34 = vadd.f32 %v109_v30, %v107_v31 }
 0x101   :  { %v120_v10 = vpop.permute.xlu0 %119  ;;  %v128_v14 = vpop.permute.xlu1 %127 }
 0x102   :  { %v125_v12 = vsel %vm89_vm1, %v120_v10, %v78_v7  ;;  %v133_v17 = vsel %vm104_vm2, %v128_v14, %v93_v8 }
 0x103   :  { %v145_v13 = vmul.f32 %v125_v12, %v71_v11  ;;  %v157_v21 = vmul.f32 %v133_v17, %v73_v16 }
 0x105   :  { %149 = vrot.lane.b32.xlu1 %v145_v13, %s970_s30 }
 0x109   :  { %v122_v19 = vpop.permute.xlu0 %121 }
 0x10a   :  { %v126_v20 = vsel %vm89_vm1, %v122_v19, %v1063_v9 }
 0x10b   :  { %v146_v22 = vmul.f32 %v126_v20, %v72_v18 }
 0x10d   :  { %161 = vrot.lane.b32.xlu1 %v157_v21, %s970_s30  ;;  %151 = vrot.lane.b32.xlu2 %v146_v22, %s970_s30 }
 0x111   :  { %v130_v25 = vpop.permute.xlu0 %129 }
 0x112   :  { %v134_v26 = vsel %vm104_vm2, %v130_v25, %v95_v15 }
 0x113   :  { %v158_v27 = vmul.f32 %v134_v26, %v74_v23 }
 0x115   :  { %139 = vrot.lane.b32.xlu1 %v70_v29, %s970_s30  ;;  %100 = vrot.lane.b32.xlu2 %v1051_v5, %s976_s13 }
 0x116   :  { %163 = vrot.lane.b32.xlu0 %v158_v27, %s970_s30  ;;  %s986_s30 = smov 56  }
 0x119   :  { %v99_v32 = vpop.permute.xlu0 %98 }
 0x11a   :  { %v105_v33 = vsel %vm104_vm2, %v93_v8, %v99_v32 }
 0x11b   :  { %v113_v35 = vmul.f32 %v105_v33, %v73_v16 }
 0x11d   :  { %v115_v36 = vadd.f32 %v113_v35, %v111_v34  ;;  %85 = vrot.lane.b32.xlu1 %v1051_v5, %s975_s0  ;;  %s990_s0 = smov 24  }
 0x11f   :  { %v117_v37 = vmul.f32 0.35355338, %v115_v36 }
 0x121   :  { %v1097_v38 = vpack.c.bf16 %v117_v37, %v117_v37 }
 0x123   :  { %v254_v39 = vunpack.c.l.b16 %v1097_v38 }
 0x125   :  { %v255_v40 = vpack.c.b16 %v254_v39, %v254_v39  ;;  %v175_v39 = vld [vmem:[%s1243_s6] sm:$0xff] }
 0x127   :  { %256 = vrot.lane.b32.xlu2 %v255_v40, %s977_s3 }
 0x167   :  { %v152_v47 = vpop.permute.xlu2 %151 }
 0x16f   :  { %v101_v55 = vpop.permute.xlu2 %100 }
 0x170   :  { %v106_v58 = vsel %vm104_vm2, %v95_v15, %v101_v55 }
 0x171   :  { %v114_v63 = vmul.f32 %v106_v58, %v74_v23 }
 0x177   :  { %v150_v41 = vpop.permute.xlu1 %149 }
 0x178   :  { %v155_v43 = vadd.f32 %v150_v41, %v143_v42 }
 0x17f   :  { %v162_v44 = vpop.permute.xlu1 %161 }
 0x180   :  { %v167_v45 = vadd.f32 %v162_v44, %v155_v43 }
 0x182   :  { %v171_v46 = vpack.c.bf16 %v167_v45, %v167_v45 }
 0x184   :  { %v177_v48 = vunpack.c.l.b16 %v171_v46 }
 0x186   :  { %v178_v49 = vpack.c.b16 %v177_v48, %v177_v48 }
 0x187   :  { %v140_v50 = vpop.permute.xlu1 %139 }
 0x188   :  { %v144_v51 = vmul.f32 %v140_v50, %v1051_v5  ;;  %258 = vrot.lane.b32.xlu1 %v178_v49, %s978_s5  ;;  %179 = vrot.lane.b32.xlu0 %v178_v49, %s979_s23  ;;  %v164_v53 = vpop.permute.xlu0 %163 }
 0x189   :  { %334 = vrot.lane.b32.xlu2 %v178_v49, %s980_s24 }
 0x18a   :  { %v156_v52 = vadd.f32 %v152_v47, %v144_v51 }
 0x18c   :  { %v168_v54 = vadd.f32 %v164_v53, %v156_v52 }
 0x18e   :  { %v172_v56 = vpack.c.bf16 %v168_v54, %v168_v54  ;;  %v174_v54 = vpack.c.bf16 %v1051_v5, %v1051_v5 }
 0x18f   :  { %v86_v57 = vpop.permute.xlu1 %85 }
 0x190   :  { %v91_v59 = vsel %vm89_vm1, %v1063_v9, %v86_v57  ;;  %410 = vrot.lane.b32.xlu0 %v178_v49, %s981_s25  ;;  %408 = vrot.lane.b32.xlu1 %v255_v40, %s982_s26  ;;  %v487_v62 = vunpack.c.l.b16 %v172_v56  ;;  %v173_v9 = vpack.c.bf16 %v1047_v4, %v1047_v4  ;;  %v257_v4 = vpop.permute.xlu2 %256  ;;  %v536_v55 = vunpack.c.l.b16 %v174_v54 }
 0x191   :  { %v110_v61 = vmul.f32 %v91_v59, %v72_v18  ;;  %v866_v59 = vld [vmem:[%s1243_s6 + $0x8] sm:$0xff]  ;;  %s988_s6 = smov 8  }
 0x192   :  { %v488_v2 = vpack.c.b16 %v487_v62, %v487_v62  ;;  %v227_v10 = vunpack.c.l.b16 %v173_v9  ;;  %v537_v58 = vpack.c.b16 %v536_v55, %v536_v55 }
 0x193   :  { %v112_v0 = vadd.f32 %v110_v61, %v108_v60 }
 0x194   :  { %v1114_v11 = vpack.c.b16 %v227_v10, %v227_v10 }
 0x195   :  { %v116_v1 = vadd.f32 %v114_v63, %v112_v0 }
 0x197   :  { %v118_v3 = vmul.f32 0.35355338, %v116_v1 }
 0x198   :  { %332 = vrot.lane.b32.xlu1 %v255_v40, %s983_s27  ;;  %566 = vrot.lane.b32.xlu0 %v488_v2, %s978_s5 }
 0x199   :  { %v170_v6 = vpack.c.bf16 %v118_v3, %v118_v3 }
 0x19b   :  { %v562_v7 = vunpack.c.l.b16 %v170_v6 }
 0x19d   :  { %v563_v8 = vpack.c.b16 %v562_v7, %v562_v7 }
 0x19f   :  { %564 = vrot.lane.b32.xlu2 %v563_v8, %s977_s3 }
 0x1a0   :  { %716 = vrot.lane.b32.xlu1 %v488_v2, %s981_s25  ;;  %489 = vrot.lane.b32.xlu0 %v488_v2, %s979_s23 }
 0x1a7   :  { %714 = vrot.lane.b32.xlu2 %v563_v8, %s982_s26 }
 0x1a8   :  { %641 = vrot.lane.b32.xlu0 %v488_v2, %s980_s24  ;;  %639 = vrot.lane.b32.xlu1 %v563_v8, %s983_s27 }
 0x1b0   :  { %229 = vrot.lane.b32.xlu0 %v1114_v11, %s984_s28  ;;  %380 = vrot.lane.b32.xlu1 %v1114_v11, %s985_s29 }
 0x1b8   :  { %304 = vrot.lane.b32.xlu0 %v1114_v11, %s986_s30 }
 0x1e3   :  { %v335_v12 = vpop.permute.xlu2 %334 }
 0x1e4   :  { %v340_v13 = vsel %vm181_vm3, %v335_v12, 0 }
 0x1e5   :  { %349 = vmatpush.bf16.xpose.msrb.mxu0 %v340_v13 }
 0x1f9   :  { %v565_v31 = vpop.permute.xlu2 %564 }
 0x1fa   :  { %v259_v14 = vpop.permute.xlu1 %258  ;;  %v180_v15 = vpop.permute.xlu0 %179 }
 0x1fb   :  { %v186_v16 = vsel %vm181_vm3, %v180_v15, 0  ;;  %v264_v17 = vsel %vm181_vm3, %v259_v14, 0 }
 0x1fc   :  { %195 = vmatpush.bf16.xpose.msra.mxu1 %v186_v16  ;;  %273 = vmatpush.bf16.xpose.msra.mxu3 %v264_v17 }
 0x202   :  { %v411_v18 = vpop.permute.xlu0 %410  ;;  %v409_v19 = vpop.permute.xlu1 %408 }
 0x203   :  { %858 = vmatmul.msk.bf16.vlgmr.msra.gmra.mxu1 %vm181_vm3, %v1097_v38  ;;  %860 = vmatmul.msk.bf16.vlgmr.msra.gmra.mxu3 %vm181_vm3, %v257_v4  ;;  %v416_v20 = vsel %vm181_vm3, %v411_v18, 0  ;;  %v715_v38 = vpop.permute.xlu2 %714 }
 0x204   :  { %425 = vmatpush.bf16.xpose.msrb.mxu3 %v416_v20 }
 0x20a   :  { %v333_v21 = vpop.permute.xlu1 %332  ;;  %v567_v22 = vpop.permute.xlu0 %566 }
 0x20b   :  { %v572_v23 = vsel %vm181_vm3, %v567_v22, 0  ;;  %862 = vmatmul.msk.bf16.vlgmr.msrb.gmra.mxu0 %vm181_vm3, %v333_v21 }
 0x20c   :  { %581 = vmatpush.bf16.xpose.msra.mxu3 %v572_v23 }
 0x212   :  { %v717_v24 = vpop.permute.xlu1 %716  ;;  %v490_v25 = vpop.permute.xlu0 %489 }
 0x213   :  { %v722_v26 = vsel %vm181_vm3, %v717_v24, 0  ;;  %v495_v27 = vsel %vm181_vm3, %v490_v25, 0  ;;  %864 = vmatmul.msk.bf16.vlgmr.msrb.gmra.mxu3 %vm181_vm3, %v409_v19 }
 0x214   :  { %504 = vmatpush.bf16.xpose.msra.mxu0 %v495_v27  ;;  %731 = vmatpush.bf16.xpose.msrb.mxu3 %v722_v26 }
 0x21a   :  { %v642_v28 = vpop.permute.xlu0 %641  ;;  %v640_v29 = vpop.permute.xlu1 %639 }
 0x21b   :  { %v647_v30 = vsel %vm181_vm3, %v642_v28, 0  ;;  %867 = vmatmul.msk.bf16.vlgmr.msra.gmra.mxu0 %vm181_vm3, %v170_v6 }
 0x21c   :  { %656 = vmatpush.bf16.xpose.msrb.mxu0 %v647_v30 }
 0x222   :  { %v230_v32 = vpop.permute.xlu0 %229  ;;  %v381_v33 = vpop.permute.xlu1 %380 }
 0x223   :  { %869 = vmatmul.msk.bf16.vlgmr.msra.gmra.mxu3 %vm181_vm3, %v565_v31  ;;  %v236_v34 = vsel %vm234_vm4, %v230_v32, 0  ;;  %v386_v35 = vsel %vm234_vm4, %v381_v33, 0 }
 0x224   :  { %245 = vmatpush.bf16.msra.mxu2 %v236_v34  ;;  %395 = vmatpush.bf16.msrb.mxu1 %v386_v35 }
 0x22a   :  { %v305_v36 = vpop.permute.xlu0 %304 }
 0x22b   :  { %871 = vmatmul.msk.bf16.vlgmr.msrb.gmra.mxu0 %vm181_vm3, %v640_v29  ;;  %v310_v37 = vsel %vm234_vm4, %v305_v36, 0 }
 0x22c   :  { %319 = vmatpush.bf16.msrb.mxu2 %v310_v37 }
 0x233   :  { %873 = vmatmul.msk.bf16.vlgmr.msrb.gmra.mxu3 %vm181_vm3, %v715_v38 }
 0x280   :  { %v197_v40 = vpop.f32.mrf.mxu1 }
 0x281   :  { %v198_v41 = vadd.f32 %v197_v40, %v175_v39 }
 0x283   :  { %v201_v42 = vsel %vm181_vm3, %v198_v41, -inf }
 0x284   :  { %202 = vmax.xlane.f32.xlu2 %v201_v42 }
 0x286   :  { %v275_v43 = vpop.f32.mrf.mxu3 }
 0x287   :  { %v276_v44 = vadd.f32 %v275_v43, %v175_v39 }
 0x288   :  { %v199_v45 = vpop.f32.mrf.mxu1  ;;  %v351_v46 = vpop.f32.mrf.mxu0 }
 0x289   :  { %v279_v47 = vsel %vm181_vm3, %v276_v44, -inf  ;;  %v352_v3 = vadd.f32 %v351_v46, %v175_v39 }
 0x28a   :  { %280 = vmax.xlane.f32.xlu1 %v279_v47 }
 0x28b   :  { %v355_v6 = vsel %vm181_vm3, %v352_v3, -inf }
 0x28e   :  { %v277_v48 = vpop.f32.mrf.mxu3 }
 0x290   :  { %v353_v49 = vpop.f32.mrf.mxu0 }
 0x296   :  { %v427_v50 = vpop.f32.mrf.mxu3 }
 0x297   :  { %v428_v51 = vadd.f32 %v427_v50, %v175_v39 }
 0x298   :  { %v506_v52 = vpop.f32.mrf.mxu0 }
 0x299   :  { %v431_v53 = vsel %vm181_vm3, %v428_v51, -inf  ;;  %v1158_v7 = vadd.f32 %v866_v59, %v506_v52 }
 0x29a   :  { %432 = vmax.xlane.f32.xlu0 %v431_v53 }
 0x29b   :  { %v510_v10 = vsel %vm181_vm3, %v1158_v7, -inf }
 0x29c   :  { %456 = vrot.lane.b32.xlu2 %v1114_v11, %s987_s10 }
 0x29e   :  { %v429_v56 = vpop.f32.mrf.mxu3 }
 0x2a0   :  { %v508_v57 = vpop.f32.mrf.mxu0 }
 0x2a3   :  { %538 = vrot.lane.b32.xlu1 %v537_v58, %s984_s28 }
 0x2a6   :  { %v583_v60 = vpop.f32.mrf.mxu3 }
 0x2a7   :  { %v584_v61 = vadd.f32 %v866_v59, %v583_v60 }
 0x2a8   :  { %v658_v62 = vpop.f32.mrf.mxu0 }
 0x2a9   :  { %v587_v63 = vsel %vm181_vm3, %v584_v61, -inf  ;;  %v1163_v11 = vadd.f32 %v866_v59, %v658_v62 }
 0x2aa   :  { %588 = vmax.xlane.f32.xlu0 %v587_v63 }
 0x2ab   :  { %v662_v4 = vsel %vm181_vm3, %v1163_v11, -inf }
 0x2ae   :  { %v585_v5 = vpop.f32.mrf.mxu3 }
 0x2b0   :  { %v660_v0 = vpop.f32.mrf.mxu0 }
 0x2b6   :  { %v733_v1 = vpop.f32.mrf.mxu3 }
 0x2b7   :  { %v734_v8 = vadd.f32 %v866_v59, %v733_v1 }
 0x2b9   :  { %v737_v9 = vsel %vm181_vm3, %v734_v8, -inf }
 0x2be   :  { %612 = vrot.lane.b32.xlu0 %v537_v58, %s986_s30  ;;  %v735_v2 = vpop.f32.mrf.mxu3 }
 0x2c5   :  { %356 = vmax.xlane.f32.xlu2 %v355_v6 }
 0x2cd   :  { %738 = vmax.xlane.f32.xlu1 %v737_v9  ;;  %511 = vmax.xlane.f32.xlu2 %v510_v10 }
 0x2e5   :  { %762 = vrot.lane.b32.xlu2 %v537_v58, %s987_s10 }
 0x2e6   :  { %687 = vrot.lane.b32.xlu1 %v537_v58, %s985_s29 }
 0x2e8   :  { %663 = vmax.xlane.f32.xlu0 %v662_v4 }
 0x2f7   :  { %v203_v12 = vpop.xlane.xlu2 %202 }
 0x2f8   :  { %v204_v13 = vsub.f32 %v198_v41, %v203_v12 }
 0x2fa   :  { %v205_v14 = vmul.f32 1.442695, %v204_v13 }
 0x2fc   :  { %912 = vpow2.f32 %v205_v14 }
 0x2fd   :  { %v281_v15 = vpop.xlane.xlu1 %280 }
 0x2fe   :  { %v282_v16 = vsub.f32 %v276_v44, %v281_v15 }
 0x2ff   :  { %v457_v19 = vpop.permute.xlu2 %456 }
 0x300   :  { %v283_v17 = vmul.f32 1.442695, %v282_v16  ;;  %v462_v21 = vsel %vm234_vm4, %v457_v19, 0 }
 0x302   :  { %v1168_v18 = vpop.eup %912  ;;  %914 = vpow2.f32 %v283_v17 }
 0x303   :  { %v225_v20 = vpack.c.bf16 %v1168_v18, %v1168_v18  ;;  %v207_v5 = vsel %vm181_vm3, %v1168_v18, 0.0 }
 0x305   :  { %859 = vmatmul.msk.bf16.vlgmr.msra.gmra.mxu2 %vm181_vm3, %v225_v20 }
 0x306   :  { %471 = vmatpush.bf16.msra.mxu2 %v462_v21 }
 0x308   :  { %v915_v22 = vpop.eup %914 }
 0x309   :  { %v285_v23 = vsel %vm181_vm3, %v915_v22, 0.0  ;;  %v303_v26 = vpack.c.bf16 %v915_v22, %v915_v22 }
 0x30a   :  { %286 = vadd.xlane.f32.xlu0 %v285_v23 }
 0x30d   :  { %v433_v24 = vpop.xlane.xlu0 %432 }
 0x30e   :  { %v434_v25 = vsub.f32 %v428_v51, %v433_v24 }
 0x310   :  { %v435_v28 = vmul.f32 1.442695, %v434_v25 }
 0x312   :  { %916 = vpow2.f32 %v435_v28 }
 0x315   :  { %v539_v27 = vpop.permute.xlu1 %538  ;;  %861 = vmatmul.msk.bf16.vlgmr.msrb.gmra.mxu2 %vm181_vm3, %v303_v26 }
 0x316   :  { %v544_v29 = vsel %vm234_vm4, %v539_v27, 0 }
 0x317   :  { %553 = vmatpush.bf16.msra.mxu1 %v544_v29 }
 0x318   :  { %v917_v32 = vpop.eup %916 }
 0x319   :  { %v455_v34 = vpack.c.bf16 %v917_v32, %v917_v32  ;;  %v437_v56 = vsel %vm181_vm3, %v917_v32, 0.0 }
 0x31d   :  { %v589_v30 = vpop.xlane.xlu0 %588 }
 0x31e   :  { %v590_v31 = vsub.f32 %v584_v61, %v589_v30 }
 0x320   :  { %v591_v33 = vmul.f32 1.442695, %v590_v31 }
 0x322   :  { %918 = vpow2.f32 %v591_v33 }
 0x325   :  { %865 = vmatmul.msk.bf16.vlgmr.msra.gmra.mxu2 %vm181_vm3, %v455_v34 }
 0x328   :  { %v919_v35 = vpop.eup %918 }
 0x329   :  { %v593_v36 = vsel %vm181_vm3, %v919_v35, 0.0  ;;  %v611_v39 = vpack.c.bf16 %v919_v35, %v919_v35 }
 0x32a   :  { %594 = vadd.xlane.f32.xlu2 %v593_v36 }
 0x330   :  { %v613_v37 = vpop.permute.xlu0 %612 }
 0x331   :  { %v618_v38 = vsel %vm234_vm4, %v613_v37, 0 }
 0x332   :  { %627 = vmatpush.bf16.msrb.mxu2 %v618_v38 }
 0x335   :  { %870 = vmatmul.msk.bf16.vlgmr.msrb.gmra.mxu2 %vm181_vm3, %v611_v39 }
 0x338   :  { %v357_v40 = vpop.xlane.xlu2 %356 }
 0x339   :  { %v358_v41 = vsub.f32 %v352_v3, %v357_v40 }
 0x33b   :  { %v359_v42 = vmul.f32 1.442695, %v358_v41 }
 0x33d   :  { %920 = vpow2.f32 %v359_v42 }
 0x340   :  { %v739_v43 = vpop.xlane.xlu1 %738  ;;  %v512_v44 = vpop.xlane.xlu2 %511 }
 0x341   :  { %v740_v45 = vsub.f32 %v734_v8, %v739_v43  ;;  %v513_v48 = vsub.f32 %v1158_v7, %v512_v44 }
 0x343   :  { %v921_v46 = vpop.eup %920  ;;  %v741_v47 = vmul.f32 1.442695, %v740_v45  ;;  %v514_v51 = vmul.f32 1.442695, %v513_v48 }
 0x344   :  { %v361_v49 = vsel %vm181_vm3, %v921_v46, 0.0  ;;  %v379_v50 = vpack.c.bf16 %v921_v46, %v921_v46 }
 0x345   :  { %922 = vpow2.f32 %v741_v47  ;;  %362 = vadd.xlane.f32.xlu0 %v361_v49 }
 0x346   :  { %863 = vmatmul.msk.bf16.vlgmr.msrb.gmra.mxu1 %vm181_vm3, %v379_v50  ;;  %924 = vpow2.f32 %v514_v51 }
 0x348   :  { %v763_v52 = vpop.permute.xlu2 %762 }
 0x349   :  { %v768_v53 = vsel %vm234_vm4, %v763_v52, 0 }
 0x34a   :  { %777 = vmatpush.bf16.msra.mxu2 %v768_v53 }
 0x34b   :  { %v923_v54 = vpop.eup %922 }
 0x34c   :  { %v761_v55 = vpack.c.bf16 %v923_v54, %v923_v54  ;;  %v925_v57 = vpop.eup %924  ;;  %v743_v59 = vsel %vm181_vm3, %v923_v54, 0.0 }
 0x34d   :  { %438 = vadd.xlane.f32.xlu0 %v437_v56  ;;  %v534_v58 = vpack.c.bf16 %v925_v57, %v925_v57  ;;  %v516_v1 = vsel %vm181_vm3, %v925_v57, 0.0 }
 0x34e   :  { %874 = vmatmul.msk.bf16.vlgmr.msra.gmra.mxu2 %vm181_vm3, %v761_v55 }
 0x355   :  { %744 = vadd.xlane.f32.xlu0 %v743_v59 }
 0x356   :  { %868 = vmatmul.msk.bf16.vlgmr.msra.gmra.mxu1 %vm181_vm3, %v534_v58 }
 0x358   :  { %v688_v60 = vpop.permute.xlu1 %687 }
 0x359   :  { %v693_v61 = vsel %vm234_vm4, %v688_v60, 0 }
 0x35a   :  { %702 = vmatpush.bf16.msrb.mxu1 %v693_v61 }
 0x35b   :  { %v664_v62 = vpop.xlane.xlu0 %663 }
 0x35c   :  { %v665_v63 = vsub.f32 %v1163_v11, %v664_v62 }
 0x35d   :  { %208 = vadd.xlane.f32.xlu0 %v207_v5 }
 0x35e   :  { %v666_v0 = vmul.f32 1.442695, %v665_v63 }
 0x360   :  { %926 = vpow2.f32 %v666_v0 }
 0x365   :  { %517 = vadd.xlane.f32.xlu0 %v516_v1 }
 0x366   :  { %v927_v2 = vpop.eup %926 }
 0x367   :  { %v686_v3 = vpack.c.bf16 %v927_v2, %v927_v2  ;;  %v668_v6 = vsel %vm181_vm3, %v927_v2, 0.0 }
 0x368   :  { %669 = vadd.xlane.f32.xlu1 %v668_v6 }
 0x369   :  { %872 = vmatmul.msk.bf16.vlgmr.msrb.gmra.mxu1 %vm181_vm3, %v686_v3 }
 0x37d   :  { %v287_v7 = vpop.xlane.xlu0 %286 }
 0x37e   :  { %928 = vrcp.f32 %v287_v7  ;;  %v299_v14 = vand.u32 2147483648, %v287_v7  ;;  %vm293_vm6 = vweird.f32 %v287_v7  ;;  %v297_v15 = vand.u32 2147483647, %v287_v7 }
 0x380   :  { %v300_v17 = vor.u32 1.1754944e-38, %v299_v14  ;;  %vm298_vm8 = vcmp.eq.f32.partialorder %v297_v15, 8.507059e+37 }
 0x384   :  { %v929_v8 = vpop.eup %928 }
 0x385   :  { %v289_v9 = vmul.f32 %v929_v8, %v287_v7  ;;  %vm294_vm5 = vweird.f32 %v929_v8 }
 0x386   :  { %vm295_vm7 = vmor %vm293_vm6, %vm294_vm5 }
 0x387   :  { %v290_v11 = vsub.f32 1.0, %v289_v9 }
 0x388   :  { %v1196_v10 = vpop.f32.mrf.mxu2 }
 0x389   :  { %v291_v4 = vmul.f32 %v929_v8, %v290_v11 }
 0x38b   :  { %v292_v13 = vadd.f32 %v929_v8, %v291_v4 }
 0x38d   :  { %v296_v16 = vsel %vm295_vm7, %v929_v8, %v292_v13 }
 0x38e   :  { %v301_v18 = vsel %vm298_vm8, %v300_v17, %v296_v16 }
 0x390   :  { %v249_v12 = vpop.f32.mrf.mxu2 }
 0x398   :  { %v321_v19 = vpop.f32.mrf.mxu2 }
 0x399   :  { %v325_v20 = vmul.f32 %v321_v19, %v301_v18 }
 0x39b   :  { %327 = vrot.lane.b32.xlu2 %v325_v20, %s988_s6 }
 0x39d   :  { %v595_v21 = vpop.xlane.xlu2 %594 }
 0x39e   :  { %930 = vrcp.f32 %v595_v21  ;;  %v607_v30 = vand.u32 2147483648, %v595_v21  ;;  %vm601_vm10 = vweird.f32 %v595_v21  ;;  %v605_v31 = vand.u32 2147483647, %v595_v21 }
 0x3a0   :  { %v323_v22 = vpop.f32.mrf.mxu2  ;;  %v608_v33 = vor.u32 1.1754944e-38, %v607_v30  ;;  %vm606_vm12 = vcmp.eq.f32.partialorder %v605_v31, 8.507059e+37 }
 0x3a4   :  { %v931_v23 = vpop.eup %930 }
 0x3a5   :  { %v597_v24 = vmul.f32 %v931_v23, %v595_v21  ;;  %vm602_vm9 = vweird.f32 %v931_v23 }
 0x3a6   :  { %vm603_vm11 = vmor %vm601_vm10, %vm602_vm9 }
 0x3a7   :  { %v598_v26 = vsub.f32 1.0, %v597_v24 }
 0x3a8   :  { %v473_v25 = vpop.f32.mrf.mxu2 }
 0x3a9   :  { %v599_v27 = vmul.f32 %v931_v23, %v598_v26 }
 0x3ab   :  { %v600_v29 = vadd.f32 %v931_v23, %v599_v27 }
 0x3ad   :  { %v604_v32 = vsel %vm603_vm11, %v931_v23, %v600_v29 }
 0x3ae   :  { %v609_v34 = vsel %vm606_vm12, %v608_v33, %v604_v32 }
 0x3b0   :  { %v475_v28 = vpop.f32.mrf.mxu2 }
 0x3b8   :  { %v629_v35 = vpop.f32.mrf.mxu2  ;;  %v363_v36 = vpop.xlane.xlu0 %362 }
 0x3b9   :  { %v633_v37 = vmul.f32 %v629_v35, %v609_v34  ;;  %932 = vrcp.f32 %v363_v36  ;;  %v375_v43 = vand.u32 2147483648, %v363_v36  ;;  %v373_v46 = vand.u32 2147483647, %v363_v36 }
 0x3ba   :  { %vm369_vm14 = vweird.f32 %v363_v36 }
 0x3bb   :  { %635 = vrot.lane.b32.xlu0 %v633_v37, %s988_s6  ;;  %v376_v49 = vor.u32 1.1754944e-38, %v375_v43  ;;  %vm374_vm1 = vcmp.eq.f32.partialorder %v373_v46, 8.507059e+37 }
 0x3bf   :  { %v933_v38 = vpop.eup %932 }
 0x3c0   :  { %v365_v39 = vmul.f32 %v933_v38, %v363_v36  ;;  %v631_v40 = vpop.f32.mrf.mxu2  ;;  %v439_v41 = vpop.xlane.xlu0 %438  ;;  %vm370_vm13 = vweird.f32 %v933_v38 }
 0x3c1   :  { %934 = vrcp.f32 %v439_v41  ;;  %vm371_vm15 = vmor %vm369_vm14, %vm370_vm13  ;;  %v451_v58 = vand.u32 2147483648, %v439_v41  ;;  %v449_v59 = vand.u32 2147483647, %v439_v41  ;;  %vm445_vm4 = vweird.f32 %v439_v41 }
 0x3c2   :  { %v366_v42 = vsub.f32 1.0, %v365_v39 }
 0x3c3   :  { %v397_v44 = vpop.f32.mrf.mxu1  ;;  %v452_v61 = vor.u32 1.1754944e-38, %v451_v58  ;;  %vm450_vm6 = vcmp.eq.f32.partialorder %v449_v59, 8.507059e+37 }
 0x3c4   :  { %v367_v45 = vmul.f32 %v933_v38, %v366_v42 }
 0x3c6   :  { %v368_v47 = vadd.f32 %v933_v38, %v367_v45 }
 0x3c7   :  { %v935_v48 = vpop.eup %934 }
 0x3c8   :  { %v441_v50 = vmul.f32 %v935_v48, %v439_v41  ;;  %v372_v51 = vsel %vm371_vm15, %v933_v38, %v368_v47  ;;  %v1200_v52 = vpop.xlane.xlu0 %744  ;;  %vm446_vm2 = vweird.f32 %v935_v48 }
 0x3c9   :  { %v377_v53 = vsel %vm374_vm1, %v376_v49, %v372_v51  ;;  %vm447_vm5 = vmor %vm445_vm4, %vm446_vm2  ;;  %v757_v45 = vand.u32 2147483648, %v1200_v52  ;;  %v755_v47 = vand.u32 2147483647, %v1200_v52 }
 0x3ca   :  { %v442_v54 = vsub.f32 1.0, %v441_v50  ;;  %v401_v55 = vmul.f32 %v397_v44, %v377_v53 }
 0x3cb   :  { %v399_v56 = vpop.f32.mrf.mxu1  ;;  %v758_v51 = vor.u32 1.1754944e-38, %v757_v45 }
 0x3cc   :  { %v443_v57 = vmul.f32 %v935_v48, %v442_v54  ;;  %403 = vrot.lane.b32.xlu1 %v401_v55, %s989_s12 }
 0x3ce   :  { %v444_v60 = vadd.f32 %v935_v48, %v443_v57  ;;  %v887_v57 = vld [vmem:[%s1239_s2] sm:$0xff] }
 0x3d0   :  { %v209_v62 = vpop.xlane.xlu0 %208  ;;  %v448_v63 = vsel %vm447_vm5, %v935_v48, %v444_v60 }
 0x3d1   :  { %936 = vrcp.f32 %v209_v62  ;;  %v1203_v5 = vpop.f32.mrf.mxu2  ;;  %v453_v0 = vsel %vm450_vm6, %v452_v61, %v448_v63  ;;  %v221_v4 = vand.u32 2147483648, %v209_v62  ;;  %v219_v15 = vand.u32 2147483647, %v209_v62 }
 0x3d2   :  { %v477_v2 = vmul.f32 %v473_v25, %v453_v0  ;;  %938 = vrcp.f32 %v1200_v52  ;;  %vm215_vm8 = vweird.f32 %v209_v62  ;;  %vm751_vm6 = vweird.f32 %v1200_v52 }
 0x3d3   :  { %v555_v1 = vpop.f32.mrf.mxu1  ;;  %v222_v19 = vor.u32 1.1754944e-38, %v221_v4  ;;  %vm220_vm10 = vcmp.eq.f32.partialorder %v219_v15, 8.507059e+37 }
 0x3d4   :  { %479 = vrot.lane.b32.xlu0 %v477_v2, %s990_s0 }
 0x3d7   :  { %v937_v3 = vpop.eup %936 }
 0x3d8   :  { %v211_v6 = vmul.f32 %v937_v3, %v209_v62  ;;  %v518_v7 = vpop.xlane.xlu0 %517  ;;  %v1207_v11 = vpop.eup %938  ;;  %vm216_vm7 = vweird.f32 %v937_v3 }
 0x3d9   :  { %940 = vrcp.f32 %v518_v7  ;;  %v781_v8 = vpop.f32.mrf.mxu2  ;;  %v747_v16 = vmul.f32 %v1207_v11, %v1200_v52  ;;  %vm217_vm9 = vmor %vm215_vm8, %vm216_vm7  ;;  %v530_v27 = vand.u32 2147483648, %v518_v7  ;;  %v528_v30 = vand.u32 2147483647, %v518_v7  ;;  %v888_v52 = vld [vmem:[%s1239_s2 + $0x8] sm:$0xff]  ;;  %s991_s2 = smov [#allocation3]  }
 0x3da   :  { %v212_v9 = vsub.f32 1.0, %v211_v6  ;;  %vm524_vm12 = vweird.f32 %v518_v7  ;;  %vm752_vm4 = vweird.f32 %v1207_v11  ;;  %vm756_vm8 = vcmp.eq.f32.partialorder %v755_v47, 8.507059e+37  ;;  %817 = vmatpush.bf16.msra.mxu0 %v888_v52  ;;  %s831_s17 = sshll.u32 %s991_s2, 4  ;;  %s832_s17 = int_to_ptr.vmem [resolvable:$true] %s831_s17 }
 0x3db   :  { %v670_v12 = vpop.xlane.xlu1 %669  ;;  %v557_v13 = vpop.f32.mrf.mxu1  ;;  %v748_v24 = vsub.f32 1.0, %v747_v16  ;;  %v531_v36 = vor.u32 1.1754944e-38, %v530_v27  ;;  %vm529_vm15 = vcmp.eq.f32.partialorder %v528_v30, 8.507059e+37  ;;  %vm753_vm7 = vmor %vm751_vm6, %vm752_vm4 }
 0x3dc   :  { %v213_v14 = vmul.f32 %v937_v3, %v212_v9  ;;  %942 = vrcp.f32 %v670_v12  ;;  %v682_v34 = vand.u32 2147483648, %v670_v12  ;;  %v680_v38 = vand.u32 2147483647, %v670_v12 }
 0x3dd   :  { %v749_v32 = vmul.f32 %v1207_v11, %v748_v24  ;;  %vm676_vm1 = vweird.f32 %v670_v12 }
 0x3de   :  { %v214_v17 = vadd.f32 %v937_v3, %v213_v14  ;;  %v683_v41 = vor.u32 1.1754944e-38, %v682_v34  ;;  %vm681_vm5 = vcmp.eq.f32.partialorder %v680_v38, 8.507059e+37  ;;  %818 = vmatpush.bf16.msra.mxu0 %v887_v57 }
 0x3df   :  { %v941_v18 = vpop.eup %940  ;;  %v750_v43 = vadd.f32 %v1207_v11, %v749_v32 }
 0x3e0   :  { %v520_v20 = vmul.f32 %v941_v18, %v518_v7  ;;  %v218_v21 = vsel %vm217_vm9, %v937_v3, %v214_v17  ;;  %vm525_vm11 = vweird.f32 %v941_v18  ;;  %vm330_vm9 = vcmask 130112  }
 0x3e1   :  { %v223_v22 = vsel %vm220_vm10, %v222_v19, %v218_v21  ;;  %vm526_vm13 = vmor %vm524_vm12, %vm525_vm11  ;;  %v754_v50 = vsel %vm753_vm7, %v1207_v11, %v750_v43  ;;  %vm482_vm10 = vcmask 261312  }
 0x3e2   :  { %v943_v23 = vpop.eup %942  ;;  %v521_v25 = vsub.f32 1.0, %v520_v20  ;;  %v251_v26 = vmul.f32 %v1196_v10, %v223_v22  ;;  %v759_v53 = vsel %vm756_vm8, %v758_v51, %v754_v50 }
 0x3e3   :  { %v672_v28 = vmul.f32 %v943_v23, %v670_v12  ;;  %vm677_vm14 = vweird.f32 %v943_v23  ;;  %v783_v54 = vmul.f32 %v1203_v5, %v759_v53 }
 0x3e4   :  { %v522_v29 = vmul.f32 %v941_v18, %v521_v25  ;;  %252 = vst.msk [vmem:[#allocation2] sm:$0xff] %vm181_vm3, %v251_v26  ;;  %vm678_vm2 = vmor %vm676_vm1, %vm677_vm14 }
 0x3e5   :  { %v673_v31 = vsub.f32 1.0, %v672_v28 }
 0x3e6   :  { %v523_v33 = vadd.f32 %v941_v18, %v522_v29  ;;  %v704_v35 = vpop.f32.mrf.mxu1 }
 0x3e7   :  { %v674_v37 = vmul.f32 %v943_v23, %v673_v31 }
 0x3e8   :  { %v527_v10 = vsel %vm526_vm13, %v941_v18, %v523_v33 }
 0x3e9   :  { %v675_v39 = vadd.f32 %v943_v23, %v674_v37  ;;  %v532_v40 = vsel %vm529_vm15, %v531_v36, %v527_v10 }
 0x3ea   :  { %v559_v42 = vmul.f32 %v555_v1, %v532_v40 }
 0x3eb   :  { %v679_v44 = vsel %vm678_vm2, %v943_v23, %v675_v39 }
 0x3ec   :  { %v684_v46 = vsel %vm681_vm5, %v683_v41, %v679_v44  ;;  %560 = vst.msk [vmem:[#allocation2 + $0x8] sm:$0xff] %vm181_vm3, %v559_v42  ;;  %vm406_vm3 = vcmask 195712  }
 0x3ed   :  { %v708_v48 = vmul.f32 %v704_v35, %v684_v46 }
 0x3ee   :  { %v706_v49 = vpop.f32.mrf.mxu1 }
 0x3ef   :  { %710 = vrot.lane.b32.xlu2 %v708_v48, %s989_s12 }
 0x3f5   :  { %v328_v55 = vpop.permute.xlu2 %327 }
 0x3f6   :  { %331 = vst.msk [vmem:[#allocation2] sm:$0xff] %vm330_vm9, %v328_v55 }
 0x3f7   :  { %785 = vrot.lane.b32.xlu2 %v783_v54, %s990_s0 }
 0x42d   :  { %v636_v56 = vpop.permute.xlu0 %635 }
 0x42e   :  { %638 = vst.msk [vmem:[#allocation2 + $0x8] sm:$0xff] %vm330_vm9, %v636_v56 }
 0x43e   :  { %v404_v58 = vpop.permute.xlu1 %403 }
 0x43f   :  { %407 = vst.msk [vmem:[#allocation2] sm:$0xff] %vm406_vm3, %v404_v58 }
 0x446   :  { %v480_v59 = vpop.permute.xlu0 %479 }
 0x447   :  { %483 = vst.msk [vmem:[#allocation2] sm:$0xff] %vm482_vm10, %v480_v59 }
 0x449   :  { %v711_v60 = vpop.permute.xlu2 %710 }
 0x44a   :  { %713 = vst.msk [vmem:[#allocation2 + $0x8] sm:$0xff] %vm406_vm3, %v711_v60 }
 0x44e   :  { %v789_v62 = vld [vmem:[#allocation2] sm:$0xff] }
 0x451   :  { %v786_v61 = vpop.permute.xlu2 %785 }
 0x452   :  { %788 = vst.msk [vmem:[#allocation2 + $0x8] sm:$0xff] %vm482_vm10, %v786_v61 }
 0x459   :  { %v790_v63 = vld [vmem:[#allocation2 + $0x8] sm:$0xff] }
 0x45a   :  { %v791_v5 = vpack.c.bf16 %v790_v63, %v789_v62 }
 0x45c   :  { %883 = vmatmul.msk.bf16.vlgmr.msra.gmra.mxu0 %vm51_vm0, %v791_v5 }
 0x4d9   :  { %v820_v0 = vpop.f32.mrf.mxu0 }
 0x4da   :  { %825 = vst.msk [vmem:[#allocation3] sm:$0xff] %vm51_vm0, %v820_v0 }
 0x4e1   :  { %v822_v1 = vpop.f32.mrf.mxu0 }
 0x4e2   :  { %826 = vst.msk [vmem:[#allocation3 + $0x8] sm:$0xff] %vm51_vm0, %v822_v1 }
 0x4e3   :  { %839 = dma.vmem_to_hbm [thread:$0]  %s832_s17, 256, %s834_s20, [#allocation4], %s992_s21, %s992_s21, %s988_s6  }
 0x4e4   :  { %968 = dma.done.wait [#allocation4], 256  }
 0x4e5   :  { %969 = vsyncadd [#allocation4], 4294967040 }
 0x4e6   :  { %844 = vsyncpa [#allocation4], 1 }

</bundles_post_ra>
